<compile_context>
chip_gen: v7x
topology: tpu7x:2x2x1
jax: 0.10.0
libtpu: 0.0.40
codegen_flags: <defaults>
</compile_context>

<pallas_src>
import functools

import numpy as np

import jax
import jax.numpy as jnp
from jax.experimental import pallas as pl
from jax.experimental.pallas import tpu as pltpu


def _round_up(v, m):
    return ((v + m - 1) // m) * m


def _sublane(*dtypes):
    item = min(np.dtype(d).itemsize for d in dtypes)
    return {4: 8, 2: 16, 1: 32}.get(item, 8)


def _vmem_budget_bytes():
    """Headroom-aware VMEM budget: ~2/3 of physical on v7x (64 MiB), 3/4 otherwise."""
    cap = 64 * 1024 * 1024  # conservative fallback (v7x-sized)
    try:
        info = pltpu.get_tpu_info()
        cap = int(getattr(info, "vmem_capacity_bytes", cap) or cap)
    except Exception:
        pass
    if cap <= 64 * 1024 * 1024:
        return (cap * 2) // 3
    return (cap * 3) // 4


def _make_mlp_kernel(relu_flags, compute_dtype):
    """Fused kernel body: (x_ref, w0_ref, ..., w_{L-1}_ref, out_ref)."""

    def kernel(x_ref, *refs):
        w_refs = refs[:-1]
        o_ref = refs[-1]
        z = x_ref[...]
        for w_ref, do_relu in zip(w_refs, relu_flags):
            zc = z.astype(compute_dtype)       # cast once per layer (no-op on f32 path)
            if do_relu:
                # ReLU on the packed operand: commutes exactly with the cast.
                zc = jnp.maximum(zc, 0)
            # Weights are already (in, out): plain zc @ W with f32 MXU accumulation.
            z = jnp.dot(zc, w_ref[...], preferred_element_type=jnp.float32)
        o_ref[...] = z.astype(o_ref.dtype)

    return kernel


def prepare_mlp_weights(weights, *, compute_dtype=jnp.bfloat16, pad_multiple=128):
    """One-time weight prep (hoist out of the per-call hot path).

    torch nn.Linear weights are (out, in); we store (in, out) so the kernel does a
    plain z @ W with no in-kernel transpose.  Only *intermediate* feature dims are
    zero-padded to `pad_multiple` (lane/MXU alignment); the first (D0) and last
    (D_out) dims stay exact so neither x nor the output needs a padded HBM copy.
    Padding is numerically exact: padded rows/cols are zero and ReLU(0) = 0.
    """
    num_layers = len(weights)
    dims = [int(weights[0].shape[1])] + [int(w.shape[0]) for w in weights]
    for i, w in enumerate(weights):
        assert tuple(w.shape) == (dims[i + 1], dims[i]), (w.shape, dims)

    dims_p = list(dims)
    for i in range(1, num_layers):  # intermediate dims only
        dims_p[i] = _round_up(dims[i], pad_multiple)

    w_ps = []
    for i, w in enumerate(weights):
        in_f, out_f = dims[i], dims[i + 1]
        in_p, out_p = dims_p[i], dims_p[i + 1]
        w_t = jnp.asarray(w).T.astype(compute_dtype)  # (in, out)
        if (in_p, out_p) == (in_f, out_f):
            w_ps.append(w_t)
        else:
            w_ps.append(jnp.zeros((in_p, out_p), dtype=compute_dtype)
                        .at[:in_f, :out_f].set(w_t))
    return w_ps, tuple(dims), tuple(dims_p)


def _choose_block_batch(batch, dims, dims_p, x_dtype, out_dtype, compute_dtype,
                        vmem_budget, w_bytes, *, target_step_bytes=2 << 20,
                        min_split_step_bytes=512 << 10):
    """Pick a batch tile by bytes-per-step, then fit it to the VMEM budget."""
    x_item = np.dtype(x_dtype).itemsize
    o_item = np.dtype(out_dtype).itemsize
    c_item = np.dtype(compute_dtype).itemsize
    sub = _sublane(x_dtype, out_dtype)
    d_in, d_out = dims[0], dims[-1]

    row_bytes = d_in * x_item + d_out * o_item

    # Big enough that the x+out tile is ~target_step_bytes (amortizes the
    # ~0.35 us/step pipeline overhead), capped by the (sublane-rounded) batch.
    bb = _round_up(-(-target_step_bytes // row_bytes), sub)
    bb = min(bb, _round_up(batch, sub))
    bb = max(bb, sub)

    def fits(b):
        io = 2 * b * row_bytes                    # double-buffered x / out tiles
        inter = b * sum(dims_p[1:]) * 4           # per-layer f32 dot results (unrolled body)
        inter += b * max(dims_p) * c_item         # cast operand copy
        slack = 2 << 20                           # Mosaic internal scratch / semaphores
        return w_bytes + io + inter + slack <= vmem_budget

    while bb > sub and not fits(bb):
        bb = max(sub, (bb // 2 // sub) * sub)

    # v7x has 2 TensorCores: prefer >=2 "parallel" grid steps when each half-step
    # still moves enough bytes to amortize the per-step overhead (no-op on v5e/v6e).
    b_ceil = _round_up(batch, sub)
    if bb >= b_ceil and b_ceil >= 2 * sub:
        half = _round_up(-(-b_ceil // 2), sub)
        if half * row_bytes >= min_split_step_bytes and fits(half):
            bb = half
    return bb


def mlp_pallas(x, prepared_weights, *, dims, dims_p, final_relu=True,
               block_batch=None, compute_dtype=jnp.bfloat16,
               single_buffer_weights=True):
    """MLP forward with one fused Pallas kernel.

    x:                 (B, D0) array (output keeps x.dtype).
    prepared_weights:  output of prepare_mlp_weights() -- (in, out) layout, padded, cast.
    dims / dims_p:     true / padded feature dims (static under jit).
    """
    num_layers = len(prepared_weights)
    final_relu_layer = num_layers if final_relu else num_layers - 1
    relu_flags = tuple(i < final_relu_layer for i in range(num_layers))

    B, D0 = x.shape
    assert int(D0) == dims[0], (D0, dims)
    d_out = dims[-1]
    out_dtype = x.dtype

    x_item = np.dtype(x.dtype).itemsize
    o_item = np.dtype(out_dtype).itemsize
    c_item = np.dtype(compute_dtype).itemsize

    w_elems = sum(int(np.prod(w.shape)) for w in prepared_weights)
    w_buf_factor = 1 if single_buffer_weights else 2
    w_bytes = w_buf_factor * c_item * w_elems

    vmem_budget = _vmem_budget_bytes()
    if w_bytes > vmem_budget // 2:
        # TODO(synk): stream weight N-tiles via pltpu.emit_pipeline for very wide layers.
        raise ValueError("MLP weights too large for the fully-resident fused kernel; "
                         "weight streaming not implemented yet.")

    sub = _sublane(x.dtype, out_dtype)
    if block_batch is None:
        block_batch = _choose_block_batch(B, dims, dims_p, x.dtype, out_dtype,
                                          compute_dtype, vmem_budget, w_bytes)
    block_batch = max(sub, _round_up(int(block_batch), sub))
    B_p = _round_up(B, block_batch)

    # Only the batch dim may need padding (features stay exact).  Skip entirely when
    # B is already a tile multiple, so the common case adds no extra HBM copy of x.
    if B_p != B:
        x_in = jnp.zeros((B_p, D0), dtype=x.dtype).at[:B].set(x)
    else:
        x_in = x

    grid = (B_p // block_batch,)
    kernel = _make_mlp_kernel(relu_flags, compute_dtype)

    def _weight_spec(shape):
        if single_buffer_weights:
            try:
                # Weights never change across grid steps -> single-buffer them.
                return pl.BlockSpec(shape, lambda i: (0, 0),
                                    pipeline_mode=pl.Buffered(1))
            except TypeError:
                pass  # older BlockSpec without pipeline_mode: fall back to default
        return pl.BlockSpec(shape, lambda i: (0, 0))

    in_specs = [pl.BlockSpec((block_batch, dims[0]), lambda i: (i, 0))]
    in_specs += [_weight_spec(tuple(w.shape)) for w in prepared_weights]
    out_specs = pl.BlockSpec((block_batch, d_out), lambda i: (i, 0))

    flops = 2 * B_p * sum(dims_p[i] * dims_p[i + 1] for i in range(num_layers))
    bytes_accessed = (B_p * dims[0] * x_item + B_p * d_out * o_item
                      + c_item * w_elems)

    y = pl.pallas_call(
        kernel,
        out_shape=jax.ShapeDtypeStruct((B_p, d_out), out_dtype),
        grid_spec=pltpu.PrefetchScalarGridSpec(
            num_scalar_prefetch=0,
            grid=grid,
            in_specs=in_specs,
            out_specs=out_specs,
        ),
        compiler_params=pltpu.CompilerParams(
            dimension_semantics=("parallel",),     # megacore-shardable on v7x
            vmem_limit_bytes=int(vmem_budget),
        ),
        cost_estimate=pl.CostEstimate(flops=flops, transcendentals=0,
                                      bytes_accessed=bytes_accessed),
    )(x_in, *prepared_weights)

    return y if B_p == B else y[:B]


def mlp_pallas_from_torch_weights(x, weights, final_relu=True, *,
                                  compute_dtype=jnp.bfloat16, pad_multiple=128,
                                  **kwargs):
    """Convenience entry (prepares weights per call -- NOT for the hot path)."""
    w_ps, dims, dims_p = prepare_mlp_weights(weights, compute_dtype=compute_dtype,
                                             pad_multiple=pad_multiple)
    return mlp_pallas(x, w_ps, dims=dims, dims_p=dims_p, final_relu=final_relu,
                      compute_dtype=compute_dtype, **kwargs)


def mlp_reference(x, weights, final_relu=True):
    """Pure-JAX reference matching the PyTorch module (f32, torch (out,in) weights)."""
    num_layers = len(weights)
    final_relu_layer = num_layers if final_relu else num_layers - 1
    z = x
    for i, w in enumerate(weights):
        if i < final_relu_layer:
            z = jnp.maximum(z, 0.0)
        z = z @ w.T
    return z


if __name__ == "__main__":
    # layer_sizes = [32, 64, 16], batch = 128.
    layer_sizes = [32, 64, 16]
    batch = 128
    final_relu = True

    key = jax.random.PRNGKey(0)
    kx, *kws = jax.random.split(key, 1 + (len(layer_sizes) - 1))

    x = jax.random.normal(kx, (batch, layer_sizes[0]), dtype=jnp.float32)

    # Deterministic weights (uniform, roughly nn.Linear scale), torch (out, in) layout.
    weights = []
    for i, kw in enumerate(kws):
        fan_in, fan_out = layer_sizes[i], layer_sizes[i + 1]
        bound = 1.0 / (fan_in ** 0.5)
        weights.append(jax.random.uniform(
            kw, (fan_out, fan_in), minval=-bound, maxval=bound, dtype=jnp.float32))

    ref = mlp_reference(x, weights, final_relu=final_relu)

    def run_once(x, compute_dtype, **kw):
        """Prepare weights once, jit the kernel-only hot path; fall back to
        double-buffered weights if this JAX build rejects pl.Buffered(1)."""
        w_ps, dims, dims_p = prepare_mlp_weights(weights, compute_dtype=compute_dtype)
        base = dict(dims=dims, dims_p=dims_p, final_relu=final_relu,
                    compute_dtype=compute_dtype, **kw)
        try:
            fn = jax.jit(functools.partial(mlp_pallas, **base))
            return jax.block_until_ready(fn(x, w_ps))
        except Exception:
            fn = jax.jit(functools.partial(mlp_pallas, single_buffer_weights=False,
                                           **base))
            return jax.block_until_ready(fn(x, w_ps))

    # bf16 compute path (bf16 operands, f32 MXU accumulation); explicit 64-row
    # tiles -> grid=(2,) so the "parallel" axis exercises the 2-TC split on v7x.
    out_bf16 = run_once(x, jnp.bfloat16, block_batch=64)
    assert out_bf16.shape == (batch, layer_sizes[-1]), out_bf16.shape
    assert jnp.allclose(out_bf16, ref, atol=5e-2, rtol=5e-2), "bf16 mismatch vs reference"

    # f32 compute path (numerical sanity; exercises the auto bytes-per-step tile chooser).
    out_f32 = run_once(x, jnp.float32)
    assert out_f32.shape == (batch, layer_sizes[-1]), out_f32.shape
    assert jnp.allclose(out_f32, ref, atol=1e-4, rtol=1e-4), "f32 mismatch vs reference"

    print("KERNEL_OK")
</pallas_src>

<mosaic_0001>
module attributes {stable_mosaic.version = 11 : i64} {
  func.func @kernel(%arg0: i32, %arg1: memref<64x32xf32, #tpu.memory_space<vmem>>, %arg2: memref<32x128xbf16, #tpu.memory_space<vmem>>, %arg3: memref<128x16xbf16, #tpu.memory_space<vmem>>, %arg4: memref<64x16xf32, #tpu.memory_space<vmem>>) attributes {dimension_semantics = [#tpu.dimension_semantics<parallel>], iteration_bounds = array<i64: 2>, scalar_prefetch = 0 : i64, scratch_operands = 0 : i64, tpu.core_type = #tpu.core_type<tc>, window_params = [{transform_indices = @transform_0, window_bounds = array<i64: 64, 32>}, {pipeline_mode = #tpu.pipeline_mode<synchronous>, transform_indices = @transform_1, window_bounds = array<i64: 32, 128>}, {pipeline_mode = #tpu.pipeline_mode<synchronous>, transform_indices = @transform_2, window_bounds = array<i64: 128, 16>}, {transform_indices = @transform_3, window_bounds = array<i64: 64, 16>}]} {
    %c0 = arith.constant 0 : index
    %c0_0 = arith.constant 0 : index
    %0 = vector.load %arg1[%c0, %c0_0] : memref<64x32xf32, #tpu.memory_space<vmem>>, vector<64x32xf32>
    %1 = arith.truncf %0 : vector<64x32xf32> to vector<64x32xbf16>
    %cst = arith.constant 0.000000e+00 : bf16
    %2 = vector.broadcast %cst : bf16 to vector<64x32xbf16>
    %3 = arith.maximumf %1, %2 : vector<64x32xbf16>
    %c0_1 = arith.constant 0 : index
    %c0_2 = arith.constant 0 : index
    %4 = vector.load %arg2[%c0_1, %c0_2] : memref<32x128xbf16, #tpu.memory_space<vmem>>, vector<32x128xbf16>
    %cst_3 = arith.constant dense<0.000000e+00> : vector<64x128xf32>
    %5 = tpu.matmul %3, %4, %cst_3 {dimension_numbers = #tpu.dot_dimension_numbers<[1], [0], [0], [1], [0, 0, 1, 1], [], []>} : vector<64x32xbf16>, vector<32x128xbf16>, vector<64x128xf32> -> vector<64x128xf32>
    %6 = arith.truncf %5 : vector<64x128xf32> to vector<64x128xbf16>
    %cst_4 = arith.constant 0.000000e+00 : bf16
    %7 = vector.broadcast %cst_4 : bf16 to vector<64x128xbf16>
    %8 = arith.maximumf %6, %7 : vector<64x128xbf16>
    %c0_5 = arith.constant 0 : index
    %c0_6 = arith.constant 0 : index
    %9 = vector.load %arg3[%c0_5, %c0_6] : memref<128x16xbf16, #tpu.memory_space<vmem>>, vector<128x16xbf16>
    %cst_7 = arith.constant dense<0.000000e+00> : vector<64x16xf32>
    %10 = tpu.matmul %8, %9, %cst_7 {dimension_numbers = #tpu.dot_dimension_numbers<[1], [0], [0], [1], [0, 0, 1, 1], [], []>} : vector<64x128xbf16>, vector<128x16xbf16>, vector<64x16xf32> -> vector<64x16xf32>
    %c0_8 = arith.constant 0 : index
    %c0_9 = arith.constant 0 : index
    %11 = vector.load %arg4[%c0_8, %c0_9] : memref<64x16xf32, #tpu.memory_space<vmem>>, vector<64x16xf32>
    tpu.vector_store %arg4[%c0_8, %c0_9], %10 {strides = array<i32>} : memref<64x16xf32, #tpu.memory_space<vmem>>, vector<64x16xf32>,
    return
  }
  func.func @transform_0(%arg0: i32) -> (i32, i32) {
    %c0_i32 = arith.constant 0 : i32
    %c0_i32_0 = arith.constant 0 : i32
    return %arg0, %c0_i32 : i32, i32
  }
  func.func @transform_1(%arg0: i32) -> (i32, i32) {
    %c0_i32 = arith.constant 0 : i32
    %c0_i32_0 = arith.constant 0 : i32
    %c0_i32_1 = arith.constant 0 : i32
    return %c0_i32, %c0_i32_0 : i32, i32
  }
  func.func @transform_2(%arg0: i32) -> (i32, i32) {
    %c0_i32 = arith.constant 0 : i32
    %c0_i32_0 = arith.constant 0 : i32
    %c0_i32_1 = arith.constant 0 : i32
    return %c0_i32, %c0_i32_0 : i32, i32
  }
  func.func @transform_3(%arg0: i32) -> (i32, i32) {
    %c0_i32 = arith.constant 0 : i32
    %c0_i32_0 = arith.constant 0 : i32
    return %arg0, %c0_i32 : i32, i32
  }
}

module attributes {stable_mosaic.version = 11 : i64} {
  func.func @kernel(%arg0: i32, %arg1: memref<64x32xf32, #tpu.memory_space<vmem>>, %arg2: memref<32x128xbf16, #tpu.memory_space<vmem>>, %arg3: memref<128x16xbf16, #tpu.memory_space<vmem>>, %arg4: memref<64x16xf32, #tpu.memory_space<vmem>>) attributes {dimension_semantics = [#tpu.dimension_semantics<parallel>], iteration_bounds = array<i64: 2>, scalar_prefetch = 0 : i64, scratch_operands = 0 : i64, tpu.core_type = #tpu.core_type<tc>, window_params = [{transform_indices = @transform_0, window_bounds = array<i64: 64, 32>}, {pipeline_mode = #tpu.pipeline_mode<synchronous>, transform_indices = @transform_1, window_bounds = array<i64: 32, 128>}, {pipeline_mode = #tpu.pipeline_mode<synchronous>, transform_indices = @transform_2, window_bounds = array<i64: 128, 16>}, {transform_indices = @transform_3, window_bounds = array<i64: 64, 16>}]} {
    %c0 = arith.constant 0 : index
    %c0_0 = arith.constant 0 : index
    %0 = vector.load %arg1[%c0, %c0_0] : memref<64x32xf32, #tpu.memory_space<vmem>>, vector<64x32xf32>
    %1 = arith.truncf %0 : vector<64x32xf32> to vector<64x32xbf16>
    %cst = arith.constant 0.000000e+00 : bf16
    %2 = vector.broadcast %cst : bf16 to vector<64x32xbf16>
    %3 = arith.maximumf %1, %2 : vector<64x32xbf16>
    %c0_1 = arith.constant 0 : index
    %c0_2 = arith.constant 0 : index
    %4 = vector.load %arg2[%c0_1, %c0_2] : memref<32x128xbf16, #tpu.memory_space<vmem>>, vector<32x128xbf16>
    %cst_3 = arith.constant dense<0.000000e+00> : vector<64x128xf32>
    %5 = tpu.matmul %3, %4, %cst_3 {dimension_numbers = #tpu.dot_dimension_numbers<[1], [0], [0], [1], [0, 0, 1, 1], [], []>} : vector<64x32xbf16>, vector<32x128xbf16>, vector<64x128xf32> -> vector<64x128xf32>
    %6 = arith.truncf %5 : vector<64x128xf32> to vector<64x128xbf16>
    %cst_4 = arith.constant 0.000000e+00 : bf16
    %7 = vector.broadcast %cst_4 : bf16 to vector<64x128xbf16>
    %8 = arith.maximumf %6, %7 : vector<64x128xbf16>
    %c0_5 = arith.constant 0 : index
    %c0_6 = arith.constant 0 : index
    %9 = vector.load %arg3[%c0_5, %c0_6] : memref<128x16xbf16, #tpu.memory_space<vmem>>, vector<128x16xbf16>
    %cst_7 = arith.constant dense<0.000000e+00> : vector<64x16xf32>
    %10 = tpu.matmul %8, %9, %cst_7 {dimension_numbers = #tpu.dot_dimension_numbers<[1], [0], [0], [1], [0, 0, 1, 1], [], []>} : vector<64x128xbf16>, vector<128x16xbf16>, vector<64x16xf32> -> vector<64x16xf32>
    %c0_8 = arith.constant 0 : index
    %c0_9 = arith.constant 0 : index
    %11 = vector.load %arg4[%c0_8, %c0_9] : memref<64x16xf32, #tpu.memory_space<vmem>>, vector<64x16xf32>
    tpu.vector_store %arg4[%c0_8, %c0_9], %10 {strides = array<i32>} : memref<64x16xf32, #tpu.memory_space<vmem>>, vector<64x16xf32>,
    return
  }
  func.func @transform_0(%arg0: i32) -> (i32, i32) {
    %c0_i32 = arith.constant 0 : i32
    %c0_i32_0 = arith.constant 0 : i32
    return %arg0, %c0_i32 : i32, i32
  }
  func.func @transform_1(%arg0: i32) -> (i32, i32) {
    %c0_i32 = arith.constant 0 : i32
    %c0_i32_0 = arith.constant 0 : i32
    %c0_i32_1 = arith.constant 0 : i32
    return %c0_i32, %c0_i32_0 : i32, i32
  }
  func.func @transform_2(%arg0: i32) -> (i32, i32) {
    %c0_i32 = arith.constant 0 : i32
    %c0_i32_0 = arith.constant 0 : i32
    %c0_i32_1 = arith.constant 0 : i32
    return %c0_i32, %c0_i32_0 : i32, i32
  }
  func.func @transform_3(%arg0: i32) -> (i32, i32) {
    %c0_i32 = arith.constant 0 : i32
    %c0_i32_0 = arith.constant 0 : i32
    return %arg0, %c0_i32 : i32, i32
  }
}

</mosaic_0001>

<bundles_post_ra>
// kernel: mlp_pallas.1
= control target key start
LH: loop header
LB: loop body
LE: loop exit
PB: predicated region body
PF: predicated region fallthrough
CT: control target
= control target key end

     0   :  { %s614_s12 = smov 0   ;;  %s680_s0 = inlined_call_operand.vmem [shape: f32[128,32], index: 0, kind: input, shape index: {}]   ;;  %s681_s1 = inlined_call_operand.vmem [shape: bf16[32,128], index: 1, kind: input, shape index: {}]   ;;  %s682_s2 = inlined_call_operand.vmem [shape: bf16[128,16], index: 2, kind: input, shape index: {}]   ;;  %s683_s3 = inlined_call_operand.vmem [shape: f32[128,16], index: 3, kind: output, shape index: {}]  }
   0x1 LB: > { %s487_s13 = sadd.s32 4294967295, %s591_s12   ;;  %p491_p0 = scmp.ge.s32.totalorder %s591_s12, 1  ;;  %s591_s12 = sphi %s614_s12, %s13_s12  }
   0x2   : > { %p138_p1 = scmp.lt.s32.totalorder %s591_s12, 3 }
   0x4   : > { %p139_p2 = pnand %p491_p0, %p138_p1 }
   0x5   : > { %v575_v0 = vld [vmem:[%s681_s1] sm:$0xff] (!%p139_p2)   ;;  %s492_s16 = sshll.u32 (!%p139_p2), %s487_s13, 3  ;;  %v576_v1 = vld [vmem:[%s681_s1 + $0x8] sm:$0xff] (!%p139_p2)   ;;  %v579_v4 = vld [vmem:[%s682_s2 + $0x10] sm:$0xff] (!%p139_p2)   ;;  %vm207_vm0 = vcmask (!%p139_p2), 261120   ;;  %v593_v16 = vmov (!%p139_p2), 0  }
   0x6   : > { %142 = sbr.rel (%p139_p2) target bundleno = 466 (0x1d2), region = 32  ;;  %p163_p3 = scmp.lt.s32.totalorder (!%p139_p2), %s492_s16, 15  ;;  %530 = vmatprep.subr.bf16.mxu0 (!%p139_p2), %v575_v0  ;;  %v577_v2 = vld [vmem:[%s682_s2] sm:$0xff] (!%p139_p2)   ;;  %v578_v3 = vld [vmem:[%s682_s2 + $0x8] sm:$0xff] (!%p139_p2)   ;;  %v580_v15 = vld [vmem:[%s682_s2 + $0x18] sm:$0xff] (!%p139_p2)   ;;  %vm422_vm1 = vcmask (!%p139_p2), 130048  }
   0x7   : > { %531 = vmatpush3.bf16.msra.mxu0 (!%p139_p2), %v575_v0  ;;  %542 = vmatprep.subr.bf16.mxu1 (!%p139_p2), %v577_v2  ;;  %v581_v22 = vld [vmem:[%s682_s2 + $0x20] sm:$0xff] (!%p139_p2)   ;;  %v582_v24 = vld [vmem:[%s682_s2 + $0x28] sm:$0xff] (!%p139_p2)   ;;  %v583_v25 = vld [vmem:[%s682_s2 + $0x30] sm:$0xff] (!%p139_p2)  }
   0x8   : > { %532 = vmatprep.subr.bf16.mxu0 (!%p139_p2), %v576_v1  ;;  %543 = vmatpush3.bf16.msra.mxu1 (!%p139_p2), %v577_v2  ;;  %v584_v26 = vld [vmem:[%s682_s2 + $0x38] sm:$0xff] (!%p139_p2)  }
   0x9   : > { %544 = vmatprep.subr.bf16.mxu1 (!%p139_p2), %v578_v3 }
   0xb   : > { %533 = vmatpush3.bf16.msra.mxu0 (!%p139_p2), %v576_v1 }
   0xc   : > { %545 = vmatpush3.bf16.msra.mxu1 (!%p139_p2), %v578_v3 }
   0xd   : > { %s685_s16 = smov (!%p163_p3, %s492_s16), 15  ;;  %546 = vmatprep.subr.bf16.mxu1 %v579_v4 }
   0xe   : > { %s493_s23 = sshll.u32 %s685_s16, 3 }
   0xf   : > { %s166_s26 = scalar_lea.vmem %s680_s0, %s493_s23  ;;  %s172_s15 = scalar_lea.vmem %s683_s3, %s493_s23 }
  0x10   : > { %v175_v5 = vld [vmem:[%s166_s26] sm:$0xff]  ;;  %v176_v6 = vld [vmem:[%s166_s26 + $0x8] sm:$0xff]  ;;  %v177_v7 = vld [vmem:[%s166_s26 + $0x10] sm:$0xff]  ;;  %547 = vmatpush3.bf16.msra.mxu1 %v579_v4 }
  0x11   : > { %v183_v8 = vpack.c.bf16 %v176_v6, %v175_v5  ;;  %v178_v9 = vld [vmem:[%s166_s26 + $0x18] sm:$0xff]  ;;  %v179_v10 = vld [vmem:[%s166_s26 + $0x20] sm:$0xff]  ;;  %v180_v11 = vld [vmem:[%s166_s26 + $0x28] sm:$0xff]  ;;  %548 = vmatprep.subr.bf16.mxu1 %v580_v15 }
  0x12   : > { %v184_v12 = vpack.c.bf16 %v178_v9, %v177_v7  ;;  %v185_v13 = vpack.c.bf16 %v180_v11, %v179_v10  ;;  %v181_v14 = vld [vmem:[%s166_s26 + $0x30] sm:$0xff]  ;;  %v182_v18 = vld [vmem:[%s166_s26 + $0x38] sm:$0xff] }
  0x13   : > { %v187_v17 = vmax.bf16 %v593_v16, %v183_v8  ;;  %v186_v21 = vpack.c.bf16 %v182_v18, %v181_v14 }
  0x14   : > { %v188_v19 = vmax.bf16 %v593_v16, %v184_v12  ;;  %v189_v20 = vmax.bf16 %v593_v16, %v185_v13  ;;  %549 = vmatpush3.bf16.msra.mxu1 %v580_v15 }
  0x15   : > { %534 = vmatprep.mubr.msk.bf16.mxu0 %vm207_vm0, %v187_v17  ;;  %v190_v23 = vmax.bf16 %v593_v16, %v186_v21  ;;  %550 = vmatprep.subr.bf16.mxu1 %v581_v22 }
  0x16   : > { %535 = vmatmul.mubr.msk.bf16.vlgmr.msra.gmra.mrb[0].mxu0 %vm207_vm0, %v188_v19 }
  0x17   : > { %538 = vmatprep.mubr.msk.bf16.mxu0 %vm207_vm0, %v189_v20 }
  0x18   : > { %551 = vmatpush3.bf16.msra.mxu1 %v581_v22 }
  0x19   : > { %552 = vmatprep.subr.bf16.mxu1 %v582_v24 }
  0x1c   : > { %553 = vmatpush3.bf16.msra.mxu1 %v582_v24 }
  0x1d   : > { %554 = vmatprep.subr.bf16.mxu1 %v583_v25 }
  0x1e   : > { %539 = vmatmul.mubr.msk.bf16.gmra.mrb[4].mxu0 %vm207_vm0, %v190_v23 }
  0x20   : > { %555 = vmatpush3.bf16.msra.mxu1 %v583_v25 }
  0x21   : > { %556 = vmatprep.subr.bf16.mxu1 %v584_v26 }
  0x24   : > { %557 = vmatpush3.bf16.msra.mxu1 %v584_v26 }
  0xe9   : > { %v536_v27 = vpop.f32.mrb[0].mxu0 }
  0xea   : > { %v254_v28 = vpop.f32.mrb[1].mxu0 }
  0xeb   : > { %v537_v29 = vpop.f32.mrb[2].mxu0 }
  0xec   : > { %v286_v30 = vpack.c.bf16 %v537_v29, %v536_v27  ;;  %v257_v31 = vpop.f32.mrb[3].mxu0 }
  0xed   : > { %v285_v32 = vpack.c.bf16 %v257_v31, %v254_v28 }
  0xee   : > { %v290_v34 = vmax.bf16 %v593_v16, %v286_v30 }
  0xef   : > { %v289_v33 = vmax.bf16 %v593_v16, %v285_v32 }
  0xf1   : > { %v540_v35 = vpop.f32.mrb[4].mxu0  ;;  %558 = vmatprep.mubr.bf16.mxu1 %v289_v33 }
  0xf2   : > { %v270_v36 = vpop.f32.mrb[5].mxu0  ;;  %559 = vmatmul.mubr.bf16.vlgmr.msra.gmra.mrb[0].mxu1 %v290_v34 }
  0xf3   : > { %v541_v37 = vpop.f32.mrb[6].mxu0 }
  0xf4   : > { %v288_v38 = vpack.c.bf16 %v541_v37, %v540_v35  ;;  %v273_v39 = vpop.f32.mrb[7].mxu0 }
  0xf5   : > { %v287_v40 = vpack.c.bf16 %v273_v39, %v270_v36 }
  0xf6   : > { %v292_v42 = vmax.bf16 %v593_v16, %v288_v38 }
  0xf7   : > { %v291_v41 = vmax.bf16 %v593_v16, %v287_v40 }
  0xf9   : > { %562 = vmatprep.mubr.bf16.mxu1 %v291_v41 }
  0xfa   : > { %563 = vmatmul.mubr.bf16.gmra.mrb[4].mxu1 %v292_v42 }
 0x1c5   : > { %v560_v43 = vpop.f32.mrb[0].mxu1 }
 0x1c6   : > { %425 = vst.msk [vmem:[%s172_s15 + $0x10] sm:$0xff] %vm422_vm1, %v560_v43  ;;  %v391_v44 = vpop.f32.mrb[1].mxu1 }
 0x1c7   : > { %423 = vst.msk [vmem:[%s172_s15] sm:$0xff] %vm422_vm1, %v391_v44  ;;  %v561_v45 = vpop.f32.mrb[2].mxu1 }
 0x1c8   : > { %426 = vst.msk [vmem:[%s172_s15 + $0x18] sm:$0xff] %vm422_vm1, %v561_v45  ;;  %v394_v46 = vpop.f32.mrb[3].mxu1 }
 0x1c9   : > { %424 = vst.msk [vmem:[%s172_s15 + $0x8] sm:$0xff] %vm422_vm1, %v394_v46 }
 0x1cd   : > { %v564_v47 = vpop.f32.mrb[4].mxu1 }
 0x1ce   : > { %429 = vst.msk [vmem:[%s172_s15 + $0x30] sm:$0xff] %vm422_vm1, %v564_v47  ;;  %v407_v48 = vpop.f32.mrb[5].mxu1 }
 0x1cf   : > { %427 = vst.msk [vmem:[%s172_s15 + $0x20] sm:$0xff] %vm422_vm1, %v407_v48  ;;  %v565_v49 = vpop.f32.mrb[6].mxu1 }
 0x1d0   : > { %430 = vst.msk [vmem:[%s172_s15 + $0x38] sm:$0xff] %vm422_vm1, %v565_v49  ;;  %v410_v50 = vpop.f32.mrb[7].mxu1 }
 0x1d1   : > { %428 = vst.msk [vmem:[%s172_s15 + $0x28] sm:$0xff] %vm422_vm1, %v410_v50 }
 0x1d2 PF: > { %s13_s12 = sadd.s32 1, %s591_s12  }
 0x1d3   : > { %p10_p4 = scmp.ge.s32.totalorder %s13_s12, 4  }
 0x1d5   :  { %12 = sbr.rel (!%p10_p4) target bundleno = 1 (0x1), region = 62 }

// kernel: mlp_pallas.1
= control target key start
LH: loop header
LB: loop body
LE: loop exit
PB: predicated region body
PF: predicated region fallthrough
CT: control target
= control target key end

     0   :  { %s614_s12 = smov 0   ;;  %s680_s0 = inlined_call_operand.vmem [shape: f32[128,32], index: 0, kind: input, shape index: {}]   ;;  %s681_s1 = inlined_call_operand.vmem [shape: bf16[32,128], index: 1, kind: input, shape index: {}]   ;;  %s682_s2 = inlined_call_operand.vmem [shape: bf16[128,16], index: 2, kind: input, shape index: {}]   ;;  %s683_s3 = inlined_call_operand.vmem [shape: f32[128,16], index: 3, kind: output, shape index: {}]  }
   0x1 LB: > { %s487_s13 = sadd.s32 4294967295, %s591_s12   ;;  %p491_p0 = scmp.ge.s32.totalorder %s591_s12, 1  ;;  %s591_s12 = sphi %s614_s12, %s13_s12  }
   0x2   : > { %p138_p1 = scmp.lt.s32.totalorder %s591_s12, 3 }
   0x4   : > { %p139_p2 = pnand %p491_p0, %p138_p1 }
   0x5   : > { %v575_v0 = vld [vmem:[%s681_s1] sm:$0xff] (!%p139_p2)   ;;  %s492_s16 = sshll.u32 (!%p139_p2), %s487_s13, 3  ;;  %v576_v1 = vld [vmem:[%s681_s1 + $0x8] sm:$0xff] (!%p139_p2)   ;;  %v579_v4 = vld [vmem:[%s682_s2 + $0x10] sm:$0xff] (!%p139_p2)   ;;  %vm207_vm0 = vcmask (!%p139_p2), 261120   ;;  %v593_v16 = vmov (!%p139_p2), 0  }
   0x6   : > { %142 = sbr.rel (%p139_p2) target bundleno = 466 (0x1d2), region = 32  ;;  %p163_p3 = scmp.lt.s32.totalorder (!%p139_p2), %s492_s16, 15  ;;  %530 = vmatprep.subr.bf16.mxu0 (!%p139_p2), %v575_v0  ;;  %v577_v2 = vld [vmem:[%s682_s2] sm:$0xff] (!%p139_p2)   ;;  %v578_v3 = vld [vmem:[%s682_s2 + $0x8] sm:$0xff] (!%p139_p2)   ;;  %v580_v15 = vld [vmem:[%s682_s2 + $0x18] sm:$0xff] (!%p139_p2)   ;;  %vm422_vm1 = vcmask (!%p139_p2), 130048  }
   0x7   : > { %531 = vmatpush3.bf16.msra.mxu0 (!%p139_p2), %v575_v0  ;;  %542 = vmatprep.subr.bf16.mxu1 (!%p139_p2), %v577_v2  ;;  %v581_v22 = vld [vmem:[%s682_s2 + $0x20] sm:$0xff] (!%p139_p2)   ;;  %v582_v24 = vld [vmem:[%s682_s2 + $0x28] sm:$0xff] (!%p139_p2)   ;;  %v583_v25 = vld [vmem:[%s682_s2 + $0x30] sm:$0xff] (!%p139_p2)  }
   0x8   : > { %532 = vmatprep.subr.bf16.mxu0 (!%p139_p2), %v576_v1  ;;  %543 = vmatpush3.bf16.msra.mxu1 (!%p139_p2), %v577_v2  ;;  %v584_v26 = vld [vmem:[%s682_s2 + $0x38] sm:$0xff] (!%p139_p2)  }
   0x9   : > { %544 = vmatprep.subr.bf16.mxu1 (!%p139_p2), %v578_v3 }
   0xb   : > { %533 = vmatpush3.bf16.msra.mxu0 (!%p139_p2), %v576_v1 }
   0xc   : > { %545 = vmatpush3.bf16.msra.mxu1 (!%p139_p2), %v578_v3 }
   0xd   : > { %s685_s16 = smov (!%p163_p3, %s492_s16), 15  ;;  %546 = vmatprep.subr.bf16.mxu1 %v579_v4 }
   0xe   : > { %s493_s23 = sshll.u32 %s685_s16, 3 }
   0xf   : > { %s166_s26 = scalar_lea.vmem %s680_s0, %s493_s23  ;;  %s172_s15 = scalar_lea.vmem %s683_s3, %s493_s23 }
  0x10   : > { %v175_v5 = vld [vmem:[%s166_s26] sm:$0xff]  ;;  %v176_v6 = vld [vmem:[%s166_s26 + $0x8] sm:$0xff]  ;;  %v177_v7 = vld [vmem:[%s166_s26 + $0x10] sm:$0xff]  ;;  %547 = vmatpush3.bf16.msra.mxu1 %v579_v4 }
  0x11   : > { %v183_v8 = vpack.c.bf16 %v176_v6, %v175_v5  ;;  %v178_v9 = vld [vmem:[%s166_s26 + $0x18] sm:$0xff]  ;;  %v179_v10 = vld [vmem:[%s166_s26 + $0x20] sm:$0xff]  ;;  %v180_v11 = vld [vmem:[%s166_s26 + $0x28] sm:$0xff]  ;;  %548 = vmatprep.subr.bf16.mxu1 %v580_v15 }
  0x12   : > { %v184_v12 = vpack.c.bf16 %v178_v9, %v177_v7  ;;  %v185_v13 = vpack.c.bf16 %v180_v11, %v179_v10  ;;  %v181_v14 = vld [vmem:[%s166_s26 + $0x30] sm:$0xff]  ;;  %v182_v18 = vld [vmem:[%s166_s26 + $0x38] sm:$0xff] }
  0x13   : > { %v187_v17 = vmax.bf16 %v593_v16, %v183_v8  ;;  %v186_v21 = vpack.c.bf16 %v182_v18, %v181_v14 }
  0x14   : > { %v188_v19 = vmax.bf16 %v593_v16, %v184_v12  ;;  %v189_v20 = vmax.bf16 %v593_v16, %v185_v13  ;;  %549 = vmatpush3.bf16.msra.mxu1 %v580_v15 }
  0x15   : > { %534 = vmatprep.mubr.msk.bf16.mxu0 %vm207_vm0, %v187_v17  ;;  %v190_v23 = vmax.bf16 %v593_v16, %v186_v21  ;;  %550 = vmatprep.subr.bf16.mxu1 %v581_v22 }
  0x16   : > { %535 = vmatmul.mubr.msk.bf16.vlgmr.msra.gmra.mrb[0].mxu0 %vm207_vm0, %v188_v19 }
  0x17   : > { %538 = vmatprep.mubr.msk.bf16.mxu0 %vm207_vm0, %v189_v20 }
  0x18   : > { %551 = vmatpush3.bf16.msra.mxu1 %v581_v22 }
  0x19   : > { %552 = vmatprep.subr.bf16.mxu1 %v582_v24 }
  0x1c   : > { %553 = vmatpush3.bf16.msra.mxu1 %v582_v24 }
  0x1d   : > { %554 = vmatprep.subr.bf16.mxu1 %v583_v25 }
  0x1e   : > { %539 = vmatmul.mubr.msk.bf16.gmra.mrb[4].mxu0 %vm207_vm0, %v190_v23 }
  0x20   : > { %555 = vmatpush3.bf16.msra.mxu1 %v583_v25 }
  0x21   : > { %556 = vmatprep.subr.bf16.mxu1 %v584_v26 }
  0x24   : > { %557 = vmatpush3.bf16.msra.mxu1 %v584_v26 }
  0xe9   : > { %v536_v27 = vpop.f32.mrb[0].mxu0 }
  0xea   : > { %v254_v28 = vpop.f32.mrb[1].mxu0 }
  0xeb   : > { %v537_v29 = vpop.f32.mrb[2].mxu0 }
  0xec   : > { %v286_v30 = vpack.c.bf16 %v537_v29, %v536_v27  ;;  %v257_v31 = vpop.f32.mrb[3].mxu0 }
  0xed   : > { %v285_v32 = vpack.c.bf16 %v257_v31, %v254_v28 }
  0xee   : > { %v290_v34 = vmax.bf16 %v593_v16, %v286_v30 }
  0xef   : > { %v289_v33 = vmax.bf16 %v593_v16, %v285_v32 }
  0xf1   : > { %v540_v35 = vpop.f32.mrb[4].mxu0  ;;  %558 = vmatprep.mubr.bf16.mxu1 %v289_v33 }
  0xf2   : > { %v270_v36 = vpop.f32.mrb[5].mxu0  ;;  %559 = vmatmul.mubr.bf16.vlgmr.msra.gmra.mrb[0].mxu1 %v290_v34 }
  0xf3   : > { %v541_v37 = vpop.f32.mrb[6].mxu0 }
  0xf4   : > { %v288_v38 = vpack.c.bf16 %v541_v37, %v540_v35  ;;  %v273_v39 = vpop.f32.mrb[7].mxu0 }
  0xf5   : > { %v287_v40 = vpack.c.bf16 %v273_v39, %v270_v36 }
  0xf6   : > { %v292_v42 = vmax.bf16 %v593_v16, %v288_v38 }
  0xf7   : > { %v291_v41 = vmax.bf16 %v593_v16, %v287_v40 }
  0xf9   : > { %562 = vmatprep.mubr.bf16.mxu1 %v291_v41 }
  0xfa   : > { %563 = vmatmul.mubr.bf16.gmra.mrb[4].mxu1 %v292_v42 }
 0x1c5   : > { %v560_v43 = vpop.f32.mrb[0].mxu1 }
 0x1c6   : > { %425 = vst.msk [vmem:[%s172_s15 + $0x10] sm:$0xff] %vm422_vm1, %v560_v43  ;;  %v391_v44 = vpop.f32.mrb[1].mxu1 }
 0x1c7   : > { %423 = vst.msk [vmem:[%s172_s15] sm:$0xff] %vm422_vm1, %v391_v44  ;;  %v561_v45 = vpop.f32.mrb[2].mxu1 }
 0x1c8   : > { %426 = vst.msk [vmem:[%s172_s15 + $0x18] sm:$0xff] %vm422_vm1, %v561_v45  ;;  %v394_v46 = vpop.f32.mrb[3].mxu1 }
 0x1c9   : > { %424 = vst.msk [vmem:[%s172_s15 + $0x8] sm:$0xff] %vm422_vm1, %v394_v46 }
 0x1cd   : > { %v564_v47 = vpop.f32.mrb[4].mxu1 }
 0x1ce   : > { %429 = vst.msk [vmem:[%s172_s15 + $0x30] sm:$0xff] %vm422_vm1, %v564_v47  ;;  %v407_v48 = vpop.f32.mrb[5].mxu1 }
 0x1cf   : > { %427 = vst.msk [vmem:[%s172_s15 + $0x20] sm:$0xff] %vm422_vm1, %v407_v48  ;;  %v565_v49 = vpop.f32.mrb[6].mxu1 }
 0x1d0   : > { %430 = vst.msk [vmem:[%s172_s15 + $0x38] sm:$0xff] %vm422_vm1, %v565_v49  ;;  %v410_v50 = vpop.f32.mrb[7].mxu1 }
 0x1d1   : > { %428 = vst.msk [vmem:[%s172_s15 + $0x28] sm:$0xff] %vm422_vm1, %v410_v50 }
 0x1d2 PF: > { %s13_s12 = sadd.s32 1, %s591_s12  }
 0x1d3   : > { %p10_p4 = scmp.ge.s32.totalorder %s13_s12, 4  }
 0x1d5   :  { %12 = sbr.rel (!%p10_p4) target bundleno = 1 (0x1), region = 62 }

</bundles_post_ra>
